<compile_context>
chip_gen: v5e
topology: v5e:2x2
jax: 0.10.0
libtpu: 0.0.40
codegen_flags: <defaults>
</compile_context>

<pallas_src>
from functools import partial

import jax
import jax.numpy as jnp
from jax.experimental import pallas as pl
from jax.experimental.pallas import tpu as pltpu

LANE = 128       # lane width: feature-dim padding granularity
ROW_ALIGN = 16   # bf16 packs 2 rows/sublane -> batch tiles rounded to 16
MAX_TB = 512     # max batch-tile rows per grid step


def _round_up(n, m):
    return (n + m - 1) // m * m


def _ceil_div(a, b):
    return -(-a // b)


def _leaky_relu(x, slope=0.2):
    # Identical to leaky_relu for slope in (0, 1); compiles to vmul + vmax.
    return jnp.maximum(x, slope * x)


def generator_kernel(x_ref,
                     w1_ref, b1_ref,
                     w2_ref, b2_ref,
                     w3_ref, b3_ref,
                     w4_ref, b4_ref,
                     out_ref):
    compute_dtype = w1_ref.dtype   # bf16 operands into the MXU

    # fc1 + leaky_relu  (f32 MXU accumulation; elementwise stays f32 on VPU/EUP)
    h = jnp.dot(x_ref[...], w1_ref[...], preferred_element_type=jnp.float32)
    h = _leaky_relu(h + b1_ref[...])
    # TODO(synk): nn.Dropout(0.25) is identity in eval mode; training-mode
    # dropout (pltpu.prng_seed + prng_random_bits mask, 1/(1-p) scale) not
    # implemented.

    # fc2 + leaky_relu
    h = jnp.dot(h.astype(compute_dtype), w2_ref[...],
                preferred_element_type=jnp.float32)
    h = _leaky_relu(h + b2_ref[...])

    # fc3 + leaky_relu
    h = jnp.dot(h.astype(compute_dtype), w3_ref[...],
                preferred_element_type=jnp.float32)
    h = _leaky_relu(h + b3_ref[...])

    # fc4 + tanh; bf16 store halves output writeback.
    h = jnp.dot(h.astype(compute_dtype), w4_ref[...],
                preferred_element_type=jnp.float32)
    out_ref[...] = jnp.tanh(h + b4_ref[...]).astype(out_ref.dtype)


def _pad2d(a, rows, cols):
    return jnp.pad(a, ((0, rows - a.shape[0]), (0, cols - a.shape[1])))


def prepare_padded_params(params):
    """One-time prep (outside the per-step forward): zero-pad every feature dim
    to a multiple of 128, cast weights to bf16 and biases to f32.  Hoisting
    this out of the jitted forward removes ~1 MB of per-call pad/cast traffic
    on a launch-bound kernel."""
    dims = [params["w1"].shape[0]] + [params[f"w{i}"].shape[1]
                                      for i in range(1, 5)]
    pdims = tuple(_round_up(d, LANE) for d in dims)
    ws, bs = [], []
    for i in range(4):
        ws.append(_pad2d(params[f"w{i+1}"], pdims[i], pdims[i + 1])
                  .astype(jnp.bfloat16))
        bs.append(_pad2d(params[f"b{i+1}"], 1, pdims[i + 1])
                  .astype(jnp.float32))
    return tuple(ws), tuple(bs)


def _choose_batch_tile(B):
    """Batch tile rows: multiple of 16 (bf16 row packing); >= 2 grid steps once
    B >= 32 (v7x megacore sharding); balanced tiles when B > MAX_TB so the last
    step isn't mostly padding; tb >= 256 for large B to fill the 256x256 MXU."""
    if B < 32:
        return _round_up(max(B, 1), ROW_ALIGN)
    n_steps = max(2, _ceil_div(B, MAX_TB))
    tb = _round_up(_ceil_div(B, n_steps), ROW_ALIGN)
    if B >= 512:
        tb = max(tb, 256)
    return min(tb, MAX_TB)


@partial(jax.jit, static_argnames=("out_dim",))
def generator_forward(x, ws, bs, *, out_dim):
    """x: [B, input_size] f32.  ws/bs: padded bf16 weights / f32 biases from
    prepare_padded_params.  Returns [B, out_dim] f32."""
    B, _ = x.shape
    pdims = [ws[0].shape[0]] + [w.shape[1] for w in ws]

    # --- batch tiling --------------------------------------------------------
    tb = _choose_batch_tile(B)
    b_pad = _round_up(B, tb)
    grid = (b_pad // tb,)

    x_p = _pad2d(x, b_pad, pdims[0]).astype(jnp.bfloat16)

    # Weights/biases: constant index_map -> DMA'd once, VMEM-resident across
    # grid steps.  (Built with an explicit helper; no late-binding lambdas.)
    def _resident_spec(shape):
        return pl.BlockSpec(shape, lambda i, _nd=len(shape): (0,) * _nd)

    in_specs = [pl.BlockSpec((tb, pdims[0]), lambda i: (i, 0))]
    args = [x_p]
    for w, b in zip(ws, bs):
        in_specs.append(_resident_spec(w.shape))
        in_specs.append(_resident_spec(b.shape))
        args += [w, b]
    out_spec = pl.BlockSpec((tb, pdims[4]), lambda i: (i, 0))

    # Advisory cost estimate: lets XLA schedule the surrounding pad/slice ops
    # around this tiny kernel instead of serializing them.
    flops = 2 * b_pad * sum(pdims[i] * pdims[i + 1] for i in range(4))
    bytes_accessed = (
        x_p.size * x_p.dtype.itemsize
        + sum(w.size * w.dtype.itemsize for w in ws)
        + sum(b.size * b.dtype.itemsize for b in bs)
        + b_pad * pdims[4] * 2)  # bf16 output
    cost = pl.CostEstimate(flops=flops,
                           transcendentals=b_pad * pdims[4],  # tanh
                           bytes_accessed=bytes_accessed)

    out_padded = pl.pallas_call(
        generator_kernel,
        out_shape=jax.ShapeDtypeStruct((b_pad, pdims[4]), jnp.bfloat16),
        grid=grid,
        in_specs=in_specs,
        out_specs=out_spec,
        compiler_params=pltpu.CompilerParams(
            dimension_semantics=("parallel",)),
        cost_estimate=cost,
    )(*args)

    return out_padded[:B, :out_dim].astype(jnp.float32)


def init_params(key, input_size, hidden_dim, output_size):
    """Deterministic PyTorch-style uniform(-1/sqrt(fan_in), 1/sqrt(fan_in)) init."""
    dims = [
        (input_size, hidden_dim),
        (hidden_dim, hidden_dim * 2),
        (hidden_dim * 2, hidden_dim * 4),
        (hidden_dim * 4, output_size),
    ]
    params = {}
    for i, (fan_in, fan_out) in enumerate(dims, start=1):
        key, kw, kb = jax.random.split(key, 3)
        bound = 1.0 / (fan_in ** 0.5)
        params[f"w{i}"] = jax.random.uniform(
            kw, (fan_in, fan_out), jnp.float32, minval=-bound, maxval=bound)
        params[f"b{i}"] = jax.random.uniform(
            kb, (1, fan_out), jnp.float32, minval=-bound, maxval=bound)
    return params


def reference_forward(x, params):
    """JAX reference mirroring the kernel's bf16-operand / f32-accumulate math."""
    h = x.astype(jnp.bfloat16)
    for i in range(1, 4):
        h = jnp.dot(h, params[f"w{i}"].astype(jnp.bfloat16),
                    preferred_element_type=jnp.float32) + params[f"b{i}"]
        h = jnp.maximum(h, 0.2 * h).astype(jnp.bfloat16)
    h = jnp.dot(h, params["w4"].astype(jnp.bfloat16),
                preferred_element_type=jnp.float32) + params["b4"]
    return jnp.tanh(h)


if __name__ == "__main__":
    # Real gan-mnist Generator shape (latent z -> 28x28 image), small batch.
    batch = 64
    input_size = 100     # latent dim
    hidden_dim = 32
    output_size = 784    # 28*28 (pads to 896 = 7*128 inside the kernel)

    key = jax.random.PRNGKey(0)
    key, kx = jax.random.split(key)
    x = jax.random.normal(kx, (batch, input_size), jnp.float32)
    params = init_params(key, input_size, hidden_dim, output_size)

    # One-time padded / bf16 parameter prep (hoisted out of the forward).
    ws, bs = prepare_padded_params(params)
    ws = jax.block_until_ready(ws)
    bs = jax.block_until_ready(bs)

    out = generator_forward(x, ws, bs, out_dim=output_size)
    out = jax.block_until_ready(out)

    ref = reference_forward(x, params)
    assert out.shape == (batch, output_size)
    # Kernel stores bf16 (tanh output in [-1,1]): allow bf16 quantization slack.
    assert jnp.allclose(out, ref, atol=2e-2, rtol=2e-2), "mismatch vs JAX reference"

    print("KERNEL_OK")
</pallas_src>

<mosaic_0001>
module attributes {stable_mosaic.version = 11 : i64} {
  func.func @generator_kernel(%arg0: i32, %arg1: memref<32x128xbf16, #tpu.memory_space<vmem>>, %arg2: memref<128x128xbf16, #tpu.memory_space<vmem>>, %arg3: memref<1x128xf32, #tpu.memory_space<vmem>>, %arg4: memref<128x128xbf16, #tpu.memory_space<vmem>>, %arg5: memref<1x128xf32, #tpu.memory_space<vmem>>, %arg6: memref<128x128xbf16, #tpu.memory_space<vmem>>, %arg7: memref<1x128xf32, #tpu.memory_space<vmem>>, %arg8: memref<128x896xbf16, #tpu.memory_space<vmem>>, %arg9: memref<1x896xf32, #tpu.memory_space<vmem>>, %arg10: memref<32x896xbf16, #tpu.memory_space<vmem>>) attributes {dimension_semantics = [#tpu.dimension_semantics<parallel>], iteration_bounds = array<i64: 2>, scalar_prefetch = 0 : i64, scratch_operands = 0 : i64, tpu.core_type = #tpu.core_type<tc>, window_params = [{transform_indices = @transform_0, window_bounds = array<i64: 32, 128>}, {pipeline_mode = #tpu.pipeline_mode<synchronous>, transform_indices = @transform_1, window_bounds = array<i64: 128, 128>}, {pipeline_mode = #tpu.pipeline_mode<synchronous>, transform_indices = @transform_2, window_bounds = array<i64: 1, 128>}, {pipeline_mode = #tpu.pipeline_mode<synchronous>, transform_indices = @transform_3, window_bounds = array<i64: 128, 128>}, {pipeline_mode = #tpu.pipeline_mode<synchronous>, transform_indices = @transform_4, window_bounds = array<i64: 1, 128>}, {pipeline_mode = #tpu.pipeline_mode<synchronous>, transform_indices = @transform_5, window_bounds = array<i64: 128, 128>}, {pipeline_mode = #tpu.pipeline_mode<synchronous>, transform_indices = @transform_6, window_bounds = array<i64: 1, 128>}, {pipeline_mode = #tpu.pipeline_mode<synchronous>, transform_indices = @transform_7, window_bounds = array<i64: 128, 896>}, {pipeline_mode = #tpu.pipeline_mode<synchronous>, transform_indices = @transform_8, window_bounds = array<i64: 1, 896>}, {transform_indices = @transform_9, window_bounds = array<i64: 32, 896>}]} {
    %c0 = arith.constant 0 : index
    %c0_0 = arith.constant 0 : index
    %0 = vector.load %arg1[%c0, %c0_0] : memref<32x128xbf16, #tpu.memory_space<vmem>>, vector<32x128xbf16>
    %c0_1 = arith.constant 0 : index
    %c0_2 = arith.constant 0 : index
    %1 = vector.load %arg2[%c0_1, %c0_2] : memref<128x128xbf16, #tpu.memory_space<vmem>>, vector<128x128xbf16>
    %cst = arith.constant dense<0.000000e+00> : vector<32x128xf32>
    %2 = tpu.matmul %0, %1, %cst {dimension_numbers = #tpu.dot_dimension_numbers<[1], [0], [0], [1], [0, 0, 1, 1], [], []>} : vector<32x128xbf16>, vector<128x128xbf16>, vector<32x128xf32> -> vector<32x128xf32>
    %c0_3 = arith.constant 0 : index
    %c0_4 = arith.constant 0 : index
    %3 = vector.load %arg3[%c0_3, %c0_4] : memref<1x128xf32, #tpu.memory_space<vmem>>, vector<1x128xf32>
    %4 = vector.broadcast %3 : vector<1x128xf32> to vector<32x128xf32>
    %5 = arith.addf %2, %4 : vector<32x128xf32>
    %cst_5 = arith.constant 2.000000e-01 : f32
    %6 = vector.broadcast %cst_5 : f32 to vector<32x128xf32>
    %7 = arith.mulf %6, %5 : vector<32x128xf32>
    %8 = arith.maximumf %5, %7 : vector<32x128xf32>
    %9 = arith.truncf %8 : vector<32x128xf32> to vector<32x128xbf16>
    %c0_6 = arith.constant 0 : index
    %c0_7 = arith.constant 0 : index
    %10 = vector.load %arg4[%c0_6, %c0_7] : memref<128x128xbf16, #tpu.memory_space<vmem>>, vector<128x128xbf16>
    %cst_8 = arith.constant dense<0.000000e+00> : vector<32x128xf32>
    %11 = tpu.matmul %9, %10, %cst_8 {dimension_numbers = #tpu.dot_dimension_numbers<[1], [0], [0], [1], [0, 0, 1, 1], [], []>} : vector<32x128xbf16>, vector<128x128xbf16>, vector<32x128xf32> -> vector<32x128xf32>
    %c0_9 = arith.constant 0 : index
    %c0_10 = arith.constant 0 : index
    %12 = vector.load %arg5[%c0_9, %c0_10] : memref<1x128xf32, #tpu.memory_space<vmem>>, vector<1x128xf32>
    %13 = vector.broadcast %12 : vector<1x128xf32> to vector<32x128xf32>
    %14 = arith.addf %11, %13 : vector<32x128xf32>
    %cst_11 = arith.constant 2.000000e-01 : f32
    %15 = vector.broadcast %cst_11 : f32 to vector<32x128xf32>
    %16 = arith.mulf %15, %14 : vector<32x128xf32>
    %17 = arith.maximumf %14, %16 : vector<32x128xf32>
    %18 = arith.truncf %17 : vector<32x128xf32> to vector<32x128xbf16>
    %c0_12 = arith.constant 0 : index
    %c0_13 = arith.constant 0 : index
    %19 = vector.load %arg6[%c0_12, %c0_13] : memref<128x128xbf16, #tpu.memory_space<vmem>>, vector<128x128xbf16>
    %cst_14 = arith.constant dense<0.000000e+00> : vector<32x128xf32>
    %20 = tpu.matmul %18, %19, %cst_14 {dimension_numbers = #tpu.dot_dimension_numbers<[1], [0], [0], [1], [0, 0, 1, 1], [], []>} : vector<32x128xbf16>, vector<128x128xbf16>, vector<32x128xf32> -> vector<32x128xf32>
    %c0_15 = arith.constant 0 : index
    %c0_16 = arith.constant 0 : index
    %21 = vector.load %arg7[%c0_15, %c0_16] : memref<1x128xf32, #tpu.memory_space<vmem>>, vector<1x128xf32>
    %22 = vector.broadcast %21 : vector<1x128xf32> to vector<32x128xf32>
    %23 = arith.addf %20, %22 : vector<32x128xf32>
    %cst_17 = arith.constant 2.000000e-01 : f32
    %24 = vector.broadcast %cst_17 : f32 to vector<32x128xf32>
    %25 = arith.mulf %24, %23 : vector<32x128xf32>
    %26 = arith.maximumf %23, %25 : vector<32x128xf32>
    %27 = arith.truncf %26 : vector<32x128xf32> to vector<32x128xbf16>
    %c0_18 = arith.constant 0 : index
    %c0_19 = arith.constant 0 : index
    %28 = vector.load %arg8[%c0_18, %c0_19] : memref<128x896xbf16, #tpu.memory_space<vmem>>, vector<128x896xbf16>
    %cst_20 = arith.constant dense<0.000000e+00> : vector<32x896xf32>
    %29 = tpu.matmul %27, %28, %cst_20 {dimension_numbers = #tpu.dot_dimension_numbers<[1], [0], [0], [1], [0, 0, 1, 1], [], []>} : vector<32x128xbf16>, vector<128x896xbf16>, vector<32x896xf32> -> vector<32x896xf32>
    %c0_21 = arith.constant 0 : index
    %c0_22 = arith.constant 0 : index
    %30 = vector.load %arg9[%c0_21, %c0_22] : memref<1x896xf32, #tpu.memory_space<vmem>>, vector<1x896xf32>
    %31 = vector.broadcast %30 : vector<1x896xf32> to vector<32x896xf32>
    %32 = arith.addf %29, %31 : vector<32x896xf32>
    %33 = math.tanh %32 : vector<32x896xf32>
    %34 = arith.truncf %33 : vector<32x896xf32> to vector<32x896xbf16>
    %c0_23 = arith.constant 0 : index
    %c0_24 = arith.constant 0 : index
    %35 = vector.load %arg10[%c0_23, %c0_24] : memref<32x896xbf16, #tpu.memory_space<vmem>>, vector<32x896xbf16>
    tpu.vector_store %arg10[%c0_23, %c0_24], %34 {strides = array<i32>} : memref<32x896xbf16, #tpu.memory_space<vmem>>, vector<32x896xbf16>,
    return
  }
  func.func @transform_0(%arg0: i32) -> (i32, i32) {
    %c0_i32 = arith.constant 0 : i32
    %c0_i32_0 = arith.constant 0 : i32
    return %arg0, %c0_i32 : i32, i32
  }
  func.func @transform_1(%arg0: i32) -> (i32, i32) {
    %c0_i32 = arith.constant 0 : i32
    %c0_i32_0 = arith.constant 0 : i32
    %c0_i32_1 = arith.constant 0 : i32
    return %c0_i32, %c0_i32_0 : i32, i32
  }
  func.func @transform_2(%arg0: i32) -> (i32, i32) {
    %c0_i32 = arith.constant 0 : i32
    %c0_i32_0 = arith.constant 0 : i32
    %c0_i32_1 = arith.constant 0 : i32
    return %c0_i32, %c0_i32_0 : i32, i32
  }
  func.func @transform_3(%arg0: i32) -> (i32, i32) {
    %c0_i32 = arith.constant 0 : i32
    %c0_i32_0 = arith.constant 0 : i32
    %c0_i32_1 = arith.constant 0 : i32
    return %c0_i32, %c0_i32_0 : i32, i32
  }
  func.func @transform_4(%arg0: i32) -> (i32, i32) {
    %c0_i32 = arith.constant 0 : i32
    %c0_i32_0 = arith.constant 0 : i32
    %c0_i32_1 = arith.constant 0 : i32
    return %c0_i32, %c0_i32_0 : i32, i32
  }
  func.func @transform_5(%arg0: i32) -> (i32, i32) {
    %c0_i32 = arith.constant 0 : i32
    %c0_i32_0 = arith.constant 0 : i32
    %c0_i32_1 = arith.constant 0 : i32
    return %c0_i32, %c0_i32_0 : i32, i32
  }
  func.func @transform_6(%arg0: i32) -> (i32, i32) {
    %c0_i32 = arith.constant 0 : i32
    %c0_i32_0 = arith.constant 0 : i32
    %c0_i32_1 = arith.constant 0 : i32
    return %c0_i32, %c0_i32_0 : i32, i32
  }
  func.func @transform_7(%arg0: i32) -> (i32, i32) {
    %c0_i32 = arith.constant 0 : i32
    %c0_i32_0 = arith.constant 0 : i32
    %c0_i32_1 = arith.constant 0 : i32
    return %c0_i32, %c0_i32_0 : i32, i32
  }
  func.func @transform_8(%arg0: i32) -> (i32, i32) {
    %c0_i32 = arith.constant 0 : i32
    %c0_i32_0 = arith.constant 0 : i32
    %c0_i32_1 = arith.constant 0 : i32
    return %c0_i32, %c0_i32_0 : i32, i32
  }
  func.func @transform_9(%arg0: i32) -> (i32, i32) {
    %c0_i32 = arith.constant 0 : i32
    %c0_i32_0 = arith.constant 0 : i32
    return %arg0, %c0_i32 : i32, i32
  }
}

</mosaic_0001>

<bundles_post_ra>
// kernel: generator_forward.1
= control target key start
LH: loop header
LB: loop body
LE: loop exit
PB: predicated region body
PF: predicated region fallthrough
CT: control target
= control target key end

     0   :  { %14 = vsyncpa [#allocation3], 0  ;;  %s2180_s0 = inlined_call_operand.vmem [shape: bf16[64,128], index: 0, kind: input, shape index: {}]   ;;  %s2181_s1 = inlined_call_operand.vmem [shape: bf16[128,128], index: 1, kind: input, shape index: {}]   ;;  %s2182_s2 = inlined_call_operand.vmem [shape: f32[1,128], index: 2, kind: input, shape index: {}]   ;;  %s2183_s3 = inlined_call_operand.vmem [shape: bf16[128,128], index: 3, kind: input, shape index: {}]   ;;  %s2184_s4 = inlined_call_operand.vmem [shape: f32[1,128], index: 4, kind: input, shape index: {}]   ;;  %s2185_s5 = inlined_call_operand.hbm [shape: bf16[128,128], index: 5, kind: input, shape index: {}]   ;;  %s2186_s6 = inlined_call_operand.vmem [shape: f32[1,128], index: 6, kind: input, shape index: {}]   ;;  %s2187_s7 = inlined_call_operand.hbm [shape: bf16[128,896], index: 7, kind: input, shape index: {}]   ;;  %s2188_s8 = inlined_call_operand.vmem [shape: f32[1,896], index: 8, kind: input, shape index: {}]   ;;  %s2189_s9 = inlined_call_operand.vmem [shape: bf16[64,896], index: 9, kind: output, shape index: {}]  }
   0x1   :  { %15 = vsyncpa [#allocation5], 0  ;;  %s1986_s30 = smov 0  }
   0x2 LB: > { %s269_s12 = sshll.u32 %s2185_s5, 4  ;;  %s1320_s13 = sadd.s32 4294967295, %s1928_s30   ;;  %s1928_s30 = sphi %s1986_s30, %s21_s30   ;;  %s270_s12 = int_to_ptr.hbm [resolvable:$true] %s269_s12 }
   0x3   : > { %p1322_p0 = scmp.ge.s32.totalorder %s1928_s30, 1  ;;  %p246_p1 = scmp.lt.s32.totalorder %s1928_s30, 3 }
   0x4   : > { %p1999_p2 = scmp.eq.s32.totalorder %s1320_s13, 0  ;;  %s1930_s16 = smov [#allocation2]  }
   0x5   : > { %p2003_p3 = pnand %p1322_p0, %p246_p1  ;;  %s271_s17 = sshll.u32 %s1930_s16, 4  ;;  %s272_s17 = int_to_ptr.vmem [resolvable:$true] %s271_s17 }
   0x6   : > { %s286_s20 = sshll.u32 %s2187_s7, 4  ;;  %s1931_s21 = smov [#allocation4]   ;;  %s287_s20 = int_to_ptr.hbm [resolvable:$true] %s286_s20 }
   0x7   : > { %p1770_p4 = pneg %p2003_p3  ;;  %s288_s22 = sshll.u32 %s1931_s21, 4  ;;  %s289_s22 = int_to_ptr.vmem [resolvable:$true] %s288_s22 }
   0x8   : > { %s1932_s23 = smov 64   ;;  %s1933_s24 = smov 4  }
   0x9   : > { %p1771_p5 = pnand %p1999_p2, %p1770_p4  ;;  %s1934_s25 = smov 448  }
   0xa   : > { %s1935_s26 = smov 28   ;;  %316 = sbr.rel (%p2003_p3) target bundleno = 698 (0x2ba), region = 56 }
   0xb   : > { %1773 = dma.hbm_to_vmem [thread:$0]  (!%p1771_p5), %s270_s12, 1024, %s272_s17, [#allocation3], %s1932_s23, %s1932_s23, %s1933_s24  }
   0xc   : > { %1776 = dma.hbm_to_vmem [thread:$0]  (!%p1771_p5), %s287_s20, 7168, %s289_s22, [#allocation5], %s1934_s25, %s1934_s25, %s1935_s26  }
   0xf   : > { %1919 = dma.done.wait (%p1999_p2), [#allocation3], 1024  }
  0x10   : > { %1921 = vsyncadd (%p1999_p2), [#allocation3], 4294966272 }
  0x11   : > { %1923 = dma.done.wait (%p1999_p2), [#allocation5], 7168  }
  0x12   : > { %1925 = vsyncadd (%p1999_p2), [#allocation5], 4294960128  ;;  %v1672_v0 = vld [vmem:[%s2181_s1 + $0x38] sm:$0xff]  ;;  %v1671_v1 = vld [vmem:[%s2181_s1 + $0x30] sm:$0xff]  ;;  %s1329_s14 = sshll.u32 %s1320_s13, 2 }
  0x13   : > { %456 = vmatpush.bf16.msra.mxu0 %v1672_v0  ;;  %v1670_v2 = vld [vmem:[%s2181_s1 + $0x28] sm:$0xff]  ;;  %v1669_v3 = vld [vmem:[%s2181_s1 + $0x20] sm:$0xff]  ;;  %v1668_v4 = vld [vmem:[%s2181_s1 + $0x18] sm:$0xff]  ;;  %p360_p6 = scmp.lt.s32.totalorder %s1329_s14, 7 }
  0x14   : > { %v1680_v5 = vld [vmem:[%s2183_s3 + $0x38] sm:$0xff]  ;;  %v1667_v6 = vld [vmem:[%s2181_s1 + $0x10] sm:$0xff]  ;;  %v1666_v8 = vld [vmem:[%s2181_s1 + $0x8] sm:$0xff] }
  0x15   : > { %s2193_s14 = smov (!%p360_p6, %s1329_s14), 7  ;;  %553 = vmatpush.bf16.msra.mxu1 %v1680_v5  ;;  %v1679_v7 = vld [vmem:[%s2183_s3 + $0x30] sm:$0xff]  ;;  %v1678_v9 = vld [vmem:[%s2183_s3 + $0x28] sm:$0xff]  ;;  %v1665_v10 = vld [vmem:[%s2181_s1] sm:$0xff] }
  0x16   : > { %s1330_s26 = sshll.u32 %s2193_s14, 2  ;;  %v1677_v11 = vld [vmem:[%s2183_s3 + $0x20] sm:$0xff]  ;;  %v1676_v14 = vld [vmem:[%s2183_s3 + $0x18] sm:$0xff]  ;;  %v1675_v15 = vld [vmem:[%s2183_s3 + $0x10] sm:$0xff] }
  0x17   : > { %457 = vmatpush.bf16.msra.mxu0 %v1671_v1  ;;  %s363_s15 = scalar_lea.vmem %s2180_s0, %s1330_s26  ;;  %v1674_v16 = vld [vmem:[%s2183_s3 + $0x8] sm:$0xff]  ;;  %v1673_v17 = vld [vmem:[%s2183_s3] sm:$0xff]  ;;  %v1688_v20 = vld [vmem:[#allocation2 + $0x38] sm:$0xff] }
  0x18   : > { %v1663_v12 = vld [vmem:[%s363_s15] sm:$0xff]  ;;  %v1664_v13 = vld [vmem:[%s363_s15 + $0x8] sm:$0xff]  ;;  %650 = vmatpush.bf16.msra.mxu2 %v1688_v20  ;;  %v1687_v21 = vld [vmem:[#allocation2 + $0x30] sm:$0xff]  ;;  %s1761_s15 = smul.u32 28, %s2193_s14 }
  0x19   : > { %554 = vmatpush.bf16.msra.mxu1 %v1679_v7  ;;  %v1795_v19 = vld [vmem:[%s2182_s2] ss:$0 sm:$0xff]  ;;  %v1686_v23 = vld [vmem:[#allocation2 + $0x28] sm:$0xff]  ;;  %v1684_v41 = vld [vmem:[#allocation2 + $0x18] sm:$0xff] }
  0x1a   : > { %v1685_v28 = vld [vmem:[#allocation2 + $0x20] sm:$0xff]  ;;  %v1683_v42 = vld [vmem:[#allocation2 + $0x10] sm:$0xff]  ;;  %v1682_v43 = vld [vmem:[#allocation2 + $0x8] sm:$0xff]  ;;  %s2144_s18 = scalar_lea.vmem %s2189_s9, %s1761_s15 }
  0x1b   : > { %458 = vmatpush.bf16.msra.mxu0 %v1670_v2  ;;  %v1681_v44 = vld [vmem:[#allocation2] sm:$0xff]  ;;  %v1635_v48 = vld [vmem:[#allocation4 + $0x188] sm:$0xf]  ;;  %v1738_v50 = vld [vmem:[#allocation4 + $0x18c] sm:$0xf] }
  0x1c   : > { %651 = vmatpush.bf16.msra.mxu2 %v1687_v21  ;;  %v2086_v45 = vld [vmem:[%s2184_s4] ss:$0 sm:$0xff]  ;;  %v1741_v49 = vld [vmem:[#allocation4 + $0x1a0] sm:$0xf0]  ;;  %v1637_v52 = vld [vmem:[#allocation4 + $0x1a4] sm:$0xf0] }
  0x1d   : > { %555 = vmatpush.bf16.msra.mxu1 %v1678_v9  ;;  %v1636_v51 = vor.u32 %v1741_v49, %v1635_v48  ;;  %v1643_v53 = vld [vmem:[#allocation4 + $0x190] sm:$0xf]  ;;  %v1742_v54 = vld [vmem:[#allocation4 + $0x1a8] sm:$0xf0]  ;;  %v1640_v56 = vor.u32 %v1738_v50, %v1637_v52  ;;  %v1739_v58 = vld [vmem:[#allocation4 + $0x194] sm:$0xf] }
  0x1e   : > { %v1644_v57 = vor.u32 %v1742_v54, %v1643_v53  ;;  %v1645_v59 = vld [vmem:[#allocation4 + $0x1ac] sm:$0xf0]  ;;  %v1734_v62 = vld [vmem:[#allocation4 + $0x168] sm:$0xf0]  ;;  %v1731_v63 = vld [vmem:[#allocation4 + $0x154] sm:$0xf] }
  0x1f   : > { %459 = vmatpush.bf16.msra.mxu0 %v1669_v3  ;;  %1047 = vmatpush.bf16.msra.mxu3 %v1636_v51  ;;  %v1648_v60 = vor.u32 %v1739_v58, %v1645_v59  ;;  %v1607_v61 = vld [vmem:[#allocation4 + $0x150] sm:$0xf]  ;;  %v1615_v2 = vld [vmem:[#allocation4 + $0x158] sm:$0xf]  ;;  %v1735_v3 = vld [vmem:[#allocation4 + $0x170] sm:$0xf0] }
  0x20   : > { %652 = vmatpush.bf16.msra.mxu2 %v1686_v23  ;;  %v1608_v0 = vor.u32 %v1734_v62, %v1607_v61  ;;  %v1609_v1 = vld [vmem:[#allocation4 + $0x16c] sm:$0xf0]  ;;  %v1616_v5 = vor.u32 %v1735_v3, %v1615_v2  ;;  %v1617_v7 = vld [vmem:[#allocation4 + $0x174] sm:$0xf0]  ;;  %v1589_v21 = vld [vmem:[#allocation4 + $0x13c] sm:$0xf0] }
  0x21   : > { %556 = vmatpush.bf16.msra.mxu1 %v1677_v11  ;;  %v1724_v11 = vld [vmem:[#allocation4 + $0x11c] sm:$0xf]  ;;  %v1523_v49 = vld [vmem:[#allocation4 + $0xa8] sm:$0xf]  ;;  %v1713_v50 = vld [vmem:[#allocation4 + $0xc0] sm:$0xf0] }
  0x22   : > { %v1720_v23 = vld [vmem:[#allocation4 + $0xf8] sm:$0xf0]  ;;  %v1710_v51 = vld [vmem:[#allocation4 + $0xac] sm:$0xf]  ;;  %v1524_v52 = vor.u32 %v1713_v50, %v1523_v49  ;;  %v1525_v53 = vld [vmem:[#allocation4 + $0xc4] sm:$0xf0] }
  0x23   : > { %460 = vmatpush.bf16.msra.mxu0 %v1668_v4  ;;  %v1612_v4 = vor.u32 %v1731_v63, %v1609_v1  ;;  %1048 = vmatpush.bf16.msra.mxu3 %v1608_v0  ;;  %v1531_v54 = vld [vmem:[#allocation4 + $0xb0] sm:$0xf]  ;;  %v1711_v58 = vld [vmem:[#allocation4 + $0xb4] sm:$0xf]  ;;  %v1706_v61 = vld [vmem:[#allocation4 + $0x88] sm:$0xf0] }
  0x24   : > { %653 = vmatpush.bf16.msra.mxu2 %v1685_v28  ;;  %v1533_v59 = vld [vmem:[#allocation4 + $0xcc] sm:$0xf0]  ;;  %v1703_v62 = vld [vmem:[#allocation4 + $0x74] sm:$0xf]  ;;  %v1503_v1 = vld [vmem:[#allocation4 + $0x78] sm:$0xf] }
  0x25   : > { %557 = vmatpush.bf16.msra.mxu1 %v1676_v14  ;;  %v1497_v0 = vld [vmem:[#allocation4 + $0x8c] sm:$0xf0]  ;;  %v1707_v2 = vld [vmem:[#allocation4 + $0x90] sm:$0xf0] }
  0x26   : > { %v1500_v3 = vor.u32 %v1703_v62, %v1497_v0  ;;  %v1575_v0 = vld [vmem:[#allocation4 + $0xf8] sm:$0xf] }
  0x27   : > { %461 = vmatpush.bf16.msra.mxu0 %v1667_v6  ;;  %v1732_v6 = vld [vmem:[#allocation4 + $0x15c] sm:$0xf] }
  0x28   : > { %654 = vmatpush.bf16.msra.mxu2 %v1684_v41  ;;  %v1620_v9 = vor.u32 %v1732_v6, %v1617_v7  ;;  %v1505_v6 = vld [vmem:[#allocation4 + $0x94] sm:$0xf0] }
  0x29   : > { %558 = vmatpush.bf16.msra.mxu1 %v1675_v15  ;;  %v1587_v15 = vld [vmem:[#allocation4 + $0x120] sm:$0xf] }
  0x2b   : > { %462 = vmatpush.bf16.msra.mxu0 %v1666_v8  ;;  %v1579_v8 = vld [vmem:[#allocation4 + $0x118] sm:$0xf] }
  0x2c   : > { %655 = vmatpush.bf16.msra.mxu2 %v1683_v42 }
  0x2d   : > { %559 = vmatpush.bf16.msra.mxu1 %v1674_v16  ;;  %v1728_v16 = vld [vmem:[#allocation4 + $0x138] sm:$0xf0] }
  0x2e   : > { %v1588_v20 = vor.u32 %v1728_v16, %v1587_v15 }
  0x2f   : > { %463 = vmatpush.bf16.msra.mxu0 %v1665_v10  ;;  %v1727_v10 = vld [vmem:[#allocation4 + $0x130] sm:$0xf0] }
  0x30   : > { %656 = vmatpush.bf16.msra.mxu2 %v1682_v43  ;;  %v1580_v14 = vor.u32 %v1727_v10, %v1579_v8  ;;  %v1467_v8 = vld [vmem:[#allocation4 + $0x38] sm:$0xf]  ;;  %v1696_v10 = vld [vmem:[#allocation4 + $0x3c] sm:$0xf] }
  0x31   : > { %560 = vmatpush.bf16.msra.mxu1 %v1673_v17  ;;  %v1725_v17 = vld [vmem:[#allocation4 + $0x124] sm:$0xf] }
  0x32   : > { %464 = vmatmul.bf16.vlgmr.msra.gmra.mxu0 %v1663_v12  ;;  %v1581_v12 = vld [vmem:[#allocation4 + $0x134] sm:$0xf0]  ;;  %1049 = vmatpush.bf16.msra.mxu3 %v1580_v14  ;;  %v1700_v14 = vld [vmem:[#allocation4 + $0x58] sm:$0xf0] }
  0x33   : > { %1066 = vmatpush.bf16.msrb.mxu0 %v1640_v56  ;;  %v1528_v56 = vor.u32 %v1710_v51, %v1525_v53  ;;  %v1595_v51 = vld [vmem:[#allocation4 + $0x128] sm:$0xf]  ;;  %v1726_v53 = vld [vmem:[#allocation4 + $0x12c] sm:$0xf] }
  0x34   : > { %657 = vmatpush.bf16.msra.mxu2 %v1681_v44 }
  0x35   : > { %1085 = vmatpush.bf16.msrb.mxu1 %v1644_v57 }
  0x37   : > { %1067 = vmatpush.bf16.msrb.mxu0 %v1612_v4  ;;  %v1504_v4 = vor.u32 %v1707_v2, %v1503_v1  ;;  %v1723_v1 = vld [vmem:[#allocation4 + $0x110] sm:$0xf0] }
  0x38   : > { %1104 = vmatpush.bf16.msrb.mxu2 %v1648_v60  ;;  %v1536_v60 = vor.u32 %v1711_v58, %v1533_v59 }
  0x39   : > { %1086 = vmatpush.bf16.msrb.mxu1 %v1616_v5  ;;  %v1704_v5 = vld [vmem:[#allocation4 + $0x7c] sm:$0xf] }
  0x3a   : > { %v1508_v7 = vor.u32 %v1704_v5, %v1505_v6  ;;  %v1539_v6 = vld [vmem:[#allocation4 + $0xb8] sm:$0xf] }
  0x3c   : > { %1105 = vmatpush.bf16.msrb.mxu2 %v1620_v9  ;;  %v1699_v9 = vld [vmem:[#allocation4 + $0x50] sm:$0xf0] }
  0x3d   : > { %1087 = vmatpush.bf16.msrb.mxu1 %v1588_v20  ;;  %v1439_v20 = vld [vmem:[#allocation4] sm:$0xf] }
  0x42   : > { %469 = vmatmul.bf16.gmra.mxu0 %v1664_v13 }
  0xaf   : > { %v465_v18 = vpop.f32.mrf.mxu0 }
  0xb0   : > { %v466_v22 = vadd.f32 %v1795_v19, %v465_v18 }
  0xb2   : > { %v475_v25 = vmul.f32 0.2, %v466_v22 }
  0xb4   : > { %v479_v29 = vmax.f32 %v466_v22, %v475_v25  ;;  %v1551_v22 = vld [vmem:[#allocation4 + $0xe0] sm:$0xf]  ;;  %v1717_v25 = vld [vmem:[#allocation4 + $0xe4] sm:$0xf] }
  0xb7   : > { %v467_v24 = vpop.f32.mrf.mxu0 }
  0xb8   : > { %v468_v26 = vadd.f32 %v1795_v19, %v467_v24  ;;  %v1592_v24 = vor.u32 %v1725_v17, %v1589_v21  ;;  %v1697_v17 = vld [vmem:[#allocation4 + $0x44] sm:$0xf]  ;;  %v1692_v21 = vld [vmem:[#allocation4 + $0x18] sm:$0xf0] }
  0xba   : > { %v476_v27 = vmul.f32 0.2, %v468_v26  ;;  %1106 = vmatpush.bf16.msrb.mxu2 %v1592_v24  ;;  %v1441_v24 = vld [vmem:[#allocation4 + $0x1c] sm:$0xf0] }
  0xbc   : > { %v480_v30 = vmax.f32 %v468_v26, %v476_v27  ;;  %v1553_v26 = vld [vmem:[#allocation4 + $0xfc] sm:$0xf0]  ;;  %v1559_v27 = vld [vmem:[#allocation4 + $0xe8] sm:$0xf] }
  0xbe   : > { %v483_v31 = vpack.c.bf16 %v480_v30, %v479_v29  ;;  %v1721_v29 = vld [vmem:[#allocation4 + $0x100] sm:$0xf0]  ;;  %v1718_v30 = vld [vmem:[#allocation4 + $0xec] sm:$0xf] }
  0xbf   : > { %v470_v32 = vpop.f32.mrf.mxu0 }
  0xc0   : > { %561 = vmatmul.bf16.vlgmr.msra.gmra.mxu1 %v483_v31  ;;  %v471_v33 = vadd.f32 %v1795_v19, %v470_v32  ;;  %v1552_v31 = vor.u32 %v1720_v23, %v1551_v22  ;;  %v1561_v32 = vld [vmem:[#allocation4 + $0x104] sm:$0xf0]  ;;  %v1689_v22 = vld [vmem:[#allocation4 + $0x4] sm:$0xf]  ;;  %v1440_v23 = vor.u32 %v1692_v21, %v1439_v20 }
  0xc1   : > { %v1519_v20 = vld [vmem:[#allocation4 + $0x88] sm:$0xf] }
  0xc2   : > { %v477_v35 = vmul.f32 0.2, %v471_v33  ;;  %1050 = vmatpush.bf16.msra.mxu3 %v1552_v31 }
  0xc4   : > { %v481_v38 = vmax.f32 %v471_v33, %v477_v35  ;;  %v1556_v35 = vor.u32 %v1717_v25, %v1553_v26  ;;  %v1447_v25 = vld [vmem:[#allocation4 + $0x8] sm:$0xf]  ;;  %v1693_v26 = vld [vmem:[#allocation4 + $0x20] sm:$0xf0] }
  0xc6   : > { %1051 = vmatpush.bf16.msra.mxu3 %v1524_v52  ;;  %v1729_v52 = vld [vmem:[#allocation4 + $0x140] sm:$0xf0] }
  0xc7   : > { %v472_v34 = vpop.f32.mrf.mxu0 }
  0xc8   : > { %v473_v36 = vadd.f32 %v1795_v19, %v472_v34  ;;  %v1584_v19 = vor.u32 %v1724_v11, %v1581_v12  ;;  %v1468_v11 = vor.u32 %v1699_v9, %v1467_v8  ;;  %v1469_v12 = vld [vmem:[#allocation4 + $0x54] sm:$0xf0]  ;;  %v1712_v8 = vld [vmem:[#allocation4 + $0xbc] sm:$0xf] }
  0xc9   : > { %v1472_v15 = vor.u32 %v1696_v10, %v1469_v12  ;;  %v1541_v10 = vld [vmem:[#allocation4 + $0xd4] sm:$0xf0]  ;;  %v1716_v12 = vld [vmem:[#allocation4 + $0xd8] sm:$0xf0] }
  0xca   : > { %v478_v37 = vmul.f32 0.2, %v473_v36  ;;  %1068 = vmatpush.bf16.msrb.mxu0 %v1584_v19 }
  0xcc   : > { %v482_v39 = vmax.f32 %v473_v36, %v478_v37  ;;  %v1560_v36 = vor.u32 %v1721_v29, %v1559_v27  ;;  %v1564_v37 = vor.u32 %v1718_v30, %v1561_v32  ;;  %v1444_v27 = vor.u32 %v1689_v22, %v1441_v24  ;;  %v1690_v29 = vld [vmem:[#allocation4 + $0xc] sm:$0xf]  ;;  %v1449_v30 = vld [vmem:[#allocation4 + $0x24] sm:$0xf0]  ;;  %v1651_v32 = vld [vmem:[#allocation4 + $0x198] sm:$0xf] }
  0xcd   : > { %v1452_v31 = vor.u32 %v1690_v29, %v1449_v30  ;;  %v1709_v22 = vld [vmem:[#allocation4 + $0xa0] sm:$0xf0]  ;;  %v1491_v29 = vld [vmem:[#allocation4 + $0x50] sm:$0xf]  ;;  %v1702_v30 = vld [vmem:[#allocation4 + $0x68] sm:$0xf0] }
  0xce   : > { %v484_v40 = vpack.c.bf16 %v482_v39, %v481_v38  ;;  %1069 = vmatpush.bf16.msrb.mxu0 %v1556_v35  ;;  %1088 = vmatpush.bf16.msrb.mxu1 %v1560_v36  ;;  %v1653_v36 = vld [vmem:[#allocation4 + $0x1b4] sm:$0xf0]  ;;  %v1701_v24 = vld [vmem:[#allocation4 + $0x60] sm:$0xf0] }
  0xcf   : > { %1107 = vmatpush.bf16.msrb.mxu2 %v1564_v37  ;;  %v1659_v37 = vld [vmem:[#allocation4 + $0x1a0] sm:$0xf] }
  0xd0   : > { %566 = vmatmul.bf16.gmra.mxu1 %v484_v40 }
  0xd2   : > { %1070 = vmatpush.bf16.msrb.mxu0 %v1528_v56  ;;  %v1603_v56 = vld [vmem:[#allocation4 + $0x130] sm:$0xf] }
  0xd3   : > { %1108 = vmatpush.bf16.msrb.mxu2 %v1536_v60  ;;  %v1567_v60 = vld [vmem:[#allocation4 + $0xf0] sm:$0xf] }
  0xd6   : > { %1071 = vmatpush.bf16.msrb.mxu0 %v1500_v3  ;;  %v2105_v3 = vor.u32 %v1723_v1, %v1575_v0 }
  0xd7   : > { %1109 = vmatpush.bf16.msrb.mxu2 %v1508_v7  ;;  %v1715_v7 = vld [vmem:[#allocation4 + $0xd0] sm:$0xf0] }
  0xd8   : > { %v1540_v9 = vor.u32 %v1715_v7, %v1539_v6 }
  0xda   : > { %1072 = vmatpush.bf16.msrb.mxu0 %v1472_v15  ;;  %v1511_v15 = vld [vmem:[#allocation4 + $0x80] sm:$0xf] }
  0xde   : > { %1073 = vmatpush.bf16.msrb.mxu0 %v1444_v27  ;;  %v1698_v27 = vld [vmem:[#allocation4 + $0x4c] sm:$0xf] }
 0x13d   : > { %v562_v46 = vpop.f32.mrf.mxu1 }
 0x13e   : > { %v2089_v47 = vadd.f32 %v2086_v45, %v562_v46 }
 0x140   : > { %v572_v55 = vmul.f32 0.2, %v2089_v47 }
 0x142   : > { %v576_v33 = vmax.f32 %v2089_v47, %v572_v55  ;;  %v1714_v55 = vld [vmem:[#allocation4 + $0xc8] sm:$0xf0] }
 0x143   : > { %v1532_v57 = vor.u32 %v1714_v55, %v1531_v54  ;;  %v1596_v54 = vor.u32 %v1729_v52, %v1595_v51  ;;  %v1597_v55 = vld [vmem:[#allocation4 + $0x144] sm:$0xf0] }
 0x144   : > { %v1600_v58 = vor.u32 %v1726_v53, %v1597_v55 }
 0x145   : > { %v564_v13 = vpop.f32.mrf.mxu1  ;;  %1089 = vmatpush.bf16.msrb.mxu1 %v1532_v57  ;;  %v1730_v57 = vld [vmem:[#allocation4 + $0x148] sm:$0xf0] }
 0x146   : > { %v565_v18 = vadd.f32 %v2086_v45, %v564_v13  ;;  %v1475_v13 = vld [vmem:[#allocation4 + $0x40] sm:$0xf]  ;;  %v2102_v59 = vor.u32 %v1730_v57, %v1603_v56 }
 0x147   : > { %v1476_v16 = vor.u32 %v1700_v14, %v1475_v13  ;;  %v1544_v13 = vor.u32 %v1712_v8, %v1541_v10 }
 0x148   : > { %v573_v28 = vmul.f32 0.2, %v565_v18 }
 0x149   : > { %1090 = vmatpush.bf16.msrb.mxu1 %v1504_v4  ;;  %v2110_v4 = vld [vmem:[%s2186_s6] ss:$0 sm:$0xff] }
 0x14a   : > { %v577_v34 = vmax.f32 %v565_v18, %v573_v28  ;;  %v1477_v18 = vld [vmem:[#allocation4 + $0x5c] sm:$0xf0]  ;;  %v1448_v28 = vor.u32 %v1693_v26, %v1447_v25  ;;  %v1520_v26 = vor.u32 %v1709_v22, %v1519_v20 }
 0x14b   : > { %v1480_v19 = vor.u32 %v1697_v17, %v1477_v18  ;;  %v1705_v17 = vld [vmem:[#allocation4 + $0x84] sm:$0xf] }
 0x14c   : > { %v580_v38 = vpack.c.bf16 %v577_v34, %v576_v33  ;;  %v1743_v33 = vld [vmem:[#allocation4 + $0x1b0] sm:$0xf0]  ;;  %v1740_v34 = vld [vmem:[#allocation4 + $0x19c] sm:$0xf] }
 0x14d   : > { %v567_v39 = vpop.f32.mrf.mxu1  ;;  %1091 = vmatpush.bf16.msrb.mxu1 %v1476_v16  ;;  %1110 = vmatpush.bf16.msrb.mxu2 %v1480_v19  ;;  %v1652_v35 = vor.u32 %v1743_v33, %v1651_v32  ;;  %v1708_v16 = vld [vmem:[#allocation4 + $0x98] sm:$0xf0]  ;;  %v1513_v19 = vld [vmem:[#allocation4 + $0x9c] sm:$0xf0] }
 0x14e   : > { %658 = vmatmul.bf16.vlgmr.msra.gmra.mxu2 %v580_v38  ;;  %v568_v40 = vadd.f32 %v2086_v45, %v567_v39  ;;  %v1744_v38 = vld [vmem:[#allocation4 + $0x1b8] sm:$0xf0]  ;;  %v1656_v39 = vor.u32 %v1740_v34, %v1653_v36  ;;  %v1512_v18 = vor.u32 %v1708_v16, %v1511_v15  ;;  %v1516_v21 = vor.u32 %v1705_v17, %v1513_v19  ;;  %v1455_v34 = vld [vmem:[#allocation4 + $0x10] sm:$0xf] }
 0x150   : > { %v574_v42 = vmul.f32 0.2, %v568_v40  ;;  %1142 = vmatpush.bf16.msra.mxu0 %v1656_v39 }
 0x151   : > { %1092 = vmatpush.bf16.msrb.mxu1 %v1448_v28  ;;  %1111 = vmatpush.bf16.msrb.mxu2 %v1452_v31  ;;  %v1485_v28 = vld [vmem:[#allocation4 + $0x64] sm:$0xf0] }
 0x152   : > { %v578_v46 = vmax.f32 %v568_v40, %v574_v42  ;;  %v2096_v40 = vor.u32 %v1744_v38, %v1659_v37  ;;  %v1736_v42 = vld [vmem:[#allocation4 + $0x178] sm:$0xf0]  ;;  %v1488_v33 = vor.u32 %v1698_v27, %v1485_v28  ;;  %v1492_v38 = vor.u32 %v1702_v30, %v1491_v29 }
 0x155   : > { %v569_v41 = vpop.f32.mrf.mxu1  ;;  %1745 = vmatpush.bf16.msra.mxu2 %v1656_v39  ;;  %1161 = vmatpush.bf16.msra.mxu1 %v2096_v40  ;;  %v1691_v39 = vld [vmem:[#allocation4 + $0x14] sm:$0xf] }
 0x156   : > { %v570_v43 = vadd.f32 %v2086_v45, %v569_v41  ;;  %v1495_v45 = vld [vmem:[#allocation4 + $0x70] sm:$0xf]  ;;  %v1623_v41 = vld [vmem:[#allocation4 + $0x160] sm:$0xf] }
 0x157   : > { %v1496_v63 = vor.u32 %v1706_v61, %v1495_v45  ;;  %v1722_v45 = vld [vmem:[#allocation4 + $0x108] sm:$0xf0]  ;;  %v1719_v61 = vld [vmem:[#allocation4 + $0xf4] sm:$0xf] }
 0x158   : > { %v575_v44 = vmul.f32 0.2, %v570_v43  ;;  %v1568_v62 = vor.u32 %v1722_v45, %v1567_v60 }
 0x159   : > { %1052 = vmatpush.bf16.msra.mxu3 %v1496_v63  ;;  %v1569_v63 = vld [vmem:[#allocation4 + $0x10c] sm:$0xf0] }
 0x15a   : > { %v579_v47 = vmax.f32 %v570_v43, %v575_v44  ;;  %v1733_v43 = vld [vmem:[#allocation4 + $0x164] sm:$0xf]  ;;  %v1624_v44 = vor.u32 %v1736_v42, %v1623_v41  ;;  %v1572_v2 = vor.u32 %v1719_v61, %v1569_v63  ;;  %v1457_v41 = vld [vmem:[#allocation4 + $0x2c] sm:$0xf0] }
 0x15c   : > { %v581_v48 = vpack.c.bf16 %v579_v47, %v578_v46  ;;  %v1625_v46 = vld [vmem:[#allocation4 + $0x17c] sm:$0xf0]  ;;  %v1631_v47 = vld [vmem:[#allocation4 + $0x168] sm:$0xf] }
 0x15d   : > { %1053 = vmatpush.bf16.msra.mxu3 %v1468_v11  ;;  %v1628_v49 = vor.u32 %v1733_v43, %v1625_v46  ;;  %v1547_v11 = vld [vmem:[#allocation4 + $0xc0] sm:$0xf]  ;;  %v1463_v46 = vld [vmem:[#allocation4 + $0x18] sm:$0xf] }
 0x15e   : > { %663 = vmatmul.bf16.gmra.mxu2 %v581_v48  ;;  %v1737_v48 = vld [vmem:[#allocation4 + $0x180] sm:$0xf0]  ;;  %v2113_v14 = vor.u32 %v1716_v12, %v1547_v11 }
 0x15f   : > { %v2099_v50 = vor.u32 %v1737_v48, %v1631_v47  ;;  %1143 = vmatpush.bf16.msra.mxu0 %v1628_v49  ;;  %1746 = vmatpush.bf16.msra.mxu2 %v1628_v49  ;;  %v1695_v47 = vld [vmem:[#allocation4 + $0x30] sm:$0xf0] }
 0x160   : > { %v1464_v52 = vor.u32 %v1695_v47, %v1463_v46 }
 0x161   : > { %1054 = vmatpush.bf16.msra.mxu3 %v1440_v23  ;;  %1162 = vmatpush.bf16.msra.mxu1 %v2099_v50  ;;  %v1483_v23 = vld [vmem:[#allocation4 + $0x48] sm:$0xf] }
 0x162   : > { %v1484_v31 = vor.u32 %v1701_v24, %v1483_v23 }
 0x163   : > { %1144 = vmatpush.bf16.msra.mxu0 %v1600_v58  ;;  %1747 = vmatpush.bf16.msra.mxu2 %v1600_v58 }
 0x165   : > { %1123 = vmatpush.bf16.msrb.mxu3 %v1652_v35  ;;  %1163 = vmatpush.bf16.msra.mxu1 %v2102_v59  ;;  %v1694_v35 = vld [vmem:[#allocation4 + $0x28] sm:$0xf0] }
 0x166   : > { %v1456_v43 = vor.u32 %v1694_v35, %v1455_v34 }
 0x167   : > { %1145 = vmatpush.bf16.msra.mxu0 %v1572_v2  ;;  %1748 = vmatpush.bf16.msra.mxu2 %v1572_v2 }
 0x169   : > { %1124 = vmatpush.bf16.msrb.mxu3 %v1624_v44  ;;  %1164 = vmatpush.bf16.msra.mxu1 %v2105_v3  ;;  %v1460_v44 = vor.u32 %v1691_v39, %v1457_v41 }
 0x16b   : > { %1146 = vmatpush.bf16.msra.mxu0 %v1544_v13  ;;  %1749 = vmatpush.bf16.msra.mxu2 %v1544_v13 }
 0x16d   : > { %1125 = vmatpush.bf16.msrb.mxu3 %v1596_v54  ;;  %1165 = vmatpush.bf16.msra.mxu1 %v2113_v14 }
 0x16f   : > { %1147 = vmatpush.bf16.msra.mxu0 %v1516_v21  ;;  %1750 = vmatpush.bf16.msra.mxu2 %v1516_v21 }
 0x171   : > { %1126 = vmatpush.bf16.msrb.mxu3 %v1568_v62  ;;  %1166 = vmatpush.bf16.msra.mxu1 %v1520_v26 }
 0x173   : > { %1148 = vmatpush.bf16.msra.mxu0 %v1488_v33  ;;  %1751 = vmatpush.bf16.msra.mxu2 %v1488_v33 }
 0x175   : > { %1127 = vmatpush.bf16.msrb.mxu3 %v1540_v9  ;;  %1167 = vmatpush.bf16.msra.mxu1 %v1492_v38 }
 0x177   : > { %1149 = vmatpush.bf16.msra.mxu0 %v1460_v44  ;;  %1752 = vmatpush.bf16.msra.mxu2 %v1460_v44 }
 0x179   : > { %1128 = vmatpush.bf16.msrb.mxu3 %v1512_v18  ;;  %1168 = vmatpush.bf16.msra.mxu1 %v1464_v52 }
 0x17d   : > { %1129 = vmatpush.bf16.msrb.mxu3 %v1484_v31 }
 0x181   : > { %1130 = vmatpush.bf16.msrb.mxu3 %v1456_v43 }
 0x1d1   : > { %v659_v5 = vpop.f32.mrf.mxu2 }
 0x1d2   : > { %v660_v25 = vadd.f32 %v2110_v4, %v659_v5 }
 0x1d4   : > { %v669_v36 = vmul.f32 0.2, %v660_v25 }
 0x1d6   : > { %v673_v48 = vmax.f32 %v660_v25, %v669_v36 }
 0x1d9   : > { %v661_v32 = vpop.f32.mrf.mxu2 }
 0x1da   : > { %v662_v37 = vadd.f32 %v2110_v4, %v661_v32 }
 0x1dc   : > { %v670_v42 = vmul.f32 0.2, %v662_v37 }
 0x1de   : > { %v674_v49 = vmax.f32 %v662_v37, %v670_v42 }
 0x1e0   : > { %v677_v51 = vpack.c.bf16 %v674_v49, %v673_v48 }
 0x1e1   : > { %v664_v53 = vpop.f32.mrf.mxu2 }
 0x1e2   : > { %1055 = vmatmul.bf16.vlgmr.msra.gmra.mxu3 %v677_v51  ;;  %1074 = vmatmul.bf16.vlgmr.msrb.gmra.mxu0 %v677_v51  ;;  %v665_v54 = vadd.f32 %v2110_v4, %v664_v53 }
 0x1e3   : > { %1093 = vmatmul.bf16.vlgmr.msrb.gmra.mxu1 %v677_v51  ;;  %1112 = vmatmul.bf16.vlgmr.msrb.gmra.mxu2 %v677_v51 }
 0x1e4   : > { %1753 = vmatpush.bf16.msra.mxu3 %v2096_v40  ;;  %v671_v56 = vmul.f32 0.2, %v665_v54  ;;  %v2128_v40 = vld [vmem:[%s2188_s8] sm:$0xff] }
 0x1e5   : > { %v747_v62 = vperm.slane %v2128_v40, 2  ;;  %v2133_v1 = vperm.slane %v2128_v40, 0  ;;  %v2155_v44 = vperm.slane %v2128_v40, 6  ;;  %v750_v53 = vperm.slane %v2128_v40, 5 }
 0x1e6   : > { %v675_v60 = vmax.f32 %v665_v54, %v671_v56 }
 0x1e8   : > { %1754 = vmatpush.bf16.msra.mxu3 %v2099_v50  ;;  %v746_v50 = vperm.slane %v2128_v40, 1 }
 0x1e9   : > { %v666_v55 = vpop.f32.mrf.mxu2 }
 0x1ea   : > { %v667_v57 = vadd.f32 %v2110_v4, %v666_v55 }
 0x1ec   : > { %v672_v58 = vmul.f32 0.2, %v667_v57  ;;  %1755 = vmatpush.bf16.msra.mxu3 %v2102_v59 }
 0x1ee   : > { %v676_v45 = vmax.f32 %v667_v57, %v672_v58  ;;  %v749_v58 = vperm.slane %v2128_v40, 4 }
 0x1f0   : > { %v678_v61 = vpack.c.bf16 %v676_v45, %v675_v60  ;;  %1756 = vmatpush.bf16.msra.mxu3 %v2105_v3  ;;  %v2136_v3 = vperm.slane %v2128_v40, 3 }
 0x1f2   : > { %1060 = vmatmul.bf16.gmra.mxu3 %v678_v61  ;;  %1079 = vmatmul.bf16.gmra.mxu0 %v678_v61 }
 0x1f3   : > { %1098 = vmatmul.bf16.gmra.mxu1 %v678_v61  ;;  %1117 = vmatmul.bf16.gmra.mxu2 %v678_v61 }
 0x1f4   : > { %1757 = vmatpush.bf16.msra.mxu3 %v2113_v14 }
 0x1f8   : > { %1758 = vmatpush.bf16.msra.mxu3 %v1520_v26 }
 0x1fc   : > { %1759 = vmatpush.bf16.msra.mxu3 %v1492_v38 }
 0x200   : > { %1760 = vmatpush.bf16.msra.mxu3 %v1464_v52 }
 0x202   : > { %1131 = vmatmul.bf16.vlgmr.msrb.gmra.mxu3 %v677_v51  ;;  %1150 = vmatmul.bf16.vlgmr.msra.gmra.mxu0 %v677_v51 }
 0x203   : > { %1155 = vmatmul.bf16.vlgmr.msra.gmra.mxu2 %v678_v61  ;;  %1169 = vmatmul.bf16.vlgmr.msra.gmra.mxu1 %v677_v51 }
 0x212   : > { %1136 = vmatmul.bf16.gmra.mxu3 %v678_v61 }
 0x222   : > { %1174 = vmatmul.bf16.vlgmr.msra.gmra.mxu3 %v678_v61 }
 0x25f   : > { %v1075_v59 = vpop.f32.mrf.mxu0 }
 0x260   : > { %v1094_v63 = vpop.f32.mrf.mxu1  ;;  %v1076_v0 = vadd.f32 %v1075_v59, %v746_v50 }
 0x261   : > { %v1095_v2 = vadd.f32 %v1094_v63, %v747_v62 }
 0x262   : > { %1798 = vtanh.f32 %v1076_v0 }
 0x263   : > { %1800 = vtanh.f32 %v1095_v2 }
 0x265   : > { %v1056_v4 = vpop.f32.mrf.mxu3 }
 0x266   : > { %v1057_v5 = vadd.f32 %v1056_v4, %v2133_v1  ;;  %v1113_v6 = vpop.f32.mrf.mxu2 }
 0x267   : > { %v1114_v7 = vadd.f32 %v1113_v6, %v2136_v3  ;;  %v1077_v8 = vpop.f32.mrf.mxu0 }
 0x268   : > { %1802 = vtanh.f32 %v1057_v5  ;;  %v1096_v9 = vpop.f32.mrf.mxu1  ;;  %v1078_v10 = vadd.f32 %v1077_v8, %v746_v50  ;;  %v1799_v12 = vpop.eup %1798 }
 0x269   : > { %1804 = vtanh.f32 %v1114_v7  ;;  %v1097_v11 = vadd.f32 %v1096_v9, %v747_v62  ;;  %v1801_v13 = vpop.eup %1800 }
 0x26a   : > { %1806 = vtanh.f32 %v1078_v10 }
 0x26b   : > { %1808 = vtanh.f32 %v1097_v11 }
 0x26d   : > { %v1058_v14 = vpop.f32.mrf.mxu3 }
 0x26e   : > { %v1803_v15 = vpop.eup %1802  ;;  %v1059_v16 = vadd.f32 %v1058_v14, %v2133_v1  ;;  %v1115_v17 = vpop.f32.mrf.mxu2 }
 0x26f   : > { %v1805_v18 = vpop.eup %1804  ;;  %v1208_v19 = vpack.c.bf16 %v1799_v12, %v1803_v15  ;;  %v1116_v20 = vadd.f32 %v1115_v17, %v2136_v3  ;;  %v1080_v21 = vpop.f32.mrf.mxu0 }
 0x270   : > { %v1209_v22 = vpack.c.bf16 %v1805_v18, %v1801_v13  ;;  %1810 = vtanh.f32 %v1059_v16  ;;  %v1099_v23 = vpop.f32.mrf.mxu1  ;;  %v1081_v24 = vadd.f32 %v1080_v21, %v746_v50  ;;  %v1807_v26 = vpop.eup %1806 }
 0x271   : > { %1224 = vst [vmem:[%s2144_s18] sm:$0xff] %v1208_v19  ;;  %1812 = vtanh.f32 %v1116_v20  ;;  %v1100_v25 = vadd.f32 %v1099_v23, %v747_v62  ;;  %v1809_v27 = vpop.eup %1808 }
 0x272   : > { %1225 = vst [vmem:[%s2144_s18 + $0x8] sm:$0xff] %v1209_v22  ;;  %1814 = vtanh.f32 %v1081_v24 }
 0x273   : > { %1816 = vtanh.f32 %v1100_v25 }
 0x275   : > { %v1061_v28 = vpop.f32.mrf.mxu3 }
 0x276   : > { %v1811_v29 = vpop.eup %1810  ;;  %v1062_v30 = vadd.f32 %v1061_v28, %v2133_v1  ;;  %v1118_v31 = vpop.f32.mrf.mxu2 }
 0x277   : > { %v1813_v32 = vpop.eup %1812  ;;  %v1212_v33 = vpack.c.bf16 %v1807_v26, %v1811_v29  ;;  %v1119_v34 = vadd.f32 %v1118_v31, %v2136_v3  ;;  %v1082_v35 = vpop.f32.mrf.mxu0 }
 0x278   : > { %v1213_v36 = vpack.c.bf16 %v1813_v32, %v1809_v27  ;;  %1818 = vtanh.f32 %v1062_v30  ;;  %v1101_v37 = vpop.f32.mrf.mxu1  ;;  %v1083_v38 = vadd.f32 %v1082_v35, %v746_v50  ;;  %v1815_v41 = vpop.eup %1814 }
 0x279   : > { %1228 = vst [vmem:[%s2144_s18 + $0x1c] sm:$0xff] %v1212_v33  ;;  %1820 = vtanh.f32 %v1119_v34  ;;  %v1102_v39 = vadd.f32 %v1101_v37, %v747_v62  ;;  %v1817_v42 = vpop.eup %1816 }
 0x27a   : > { %1229 = vst [vmem:[%s2144_s18 + $0x24] sm:$0xff] %v1213_v36  ;;  %1822 = vtanh.f32 %v1083_v38 }
 0x27b   : > { %1824 = vtanh.f32 %v1102_v39 }
 0x27d   : > { %v1063_v43 = vpop.f32.mrf.mxu3 }
 0x27e   : > { %v1819_v46 = vpop.eup %1818  ;;  %v1064_v47 = vadd.f32 %v1063_v43, %v2133_v1  ;;  %v1120_v48 = vpop.f32.mrf.mxu2 }
 0x27f   : > { %v1821_v49 = vpop.eup %1820  ;;  %v1216_v51 = vpack.c.bf16 %v1815_v41, %v1819_v46  ;;  %v1121_v52 = vadd.f32 %v1120_v48, %v2136_v3  ;;  %v1151_v54 = vpop.f32.mrf.mxu0 }
 0x280   : > { %v1217_v55 = vpack.c.bf16 %v1821_v49, %v1817_v42  ;;  %1826 = vtanh.f32 %v1064_v47  ;;  %v1170_v56 = vpop.f32.mrf.mxu1  ;;  %v1152_v60 = vadd.f32 %v1151_v54, %v750_v53  ;;  %v1823_v45 = vpop.eup %1822 }
 0x281   : > { %1232 = vst [vmem:[%s2144_s18 + $0x38] sm:$0xff] %v1216_v51  ;;  %1828 = vtanh.f32 %v1121_v52  ;;  %v1171_v57 = vadd.f32 %v1170_v56, %v2155_v44  ;;  %v1825_v61 = vpop.eup %1824 }
 0x282   : > { %1233 = vst [vmem:[%s2144_s18 + $0x40] sm:$0xff] %v1217_v55 }
 0x283   : > { %1830 = vtanh.f32 %v1171_v57 }
 0x284   : > { %1832 = vtanh.f32 %v1152_v60 }
 0x285   : > { %v1132_v50 = vpop.f32.mrf.mxu3 }
 0x286   : > { %v1827_v59 = vpop.eup %1826  ;;  %v1133_v62 = vadd.f32 %v1132_v50, %v749_v58  ;;  %v1156_v10 = vpop.f32.mrf.mxu2 }
 0x287   : > { %v1829_v63 = vpop.eup %1828  ;;  %v1220_v0 = vpack.c.bf16 %v1823_v45, %v1827_v59  ;;  %v1153_v2 = vpop.f32.mrf.mxu0  ;;  %v1157_v15 = vadd.f32 %v1156_v10, %v750_v53 }
 0x288   : > { %v1221_v1 = vpack.c.bf16 %v1829_v63, %v1825_v61  ;;  %1834 = vtanh.f32 %v1133_v62  ;;  %v1172_v3 = vpop.f32.mrf.mxu1  ;;  %v1154_v6 = vadd.f32 %v1153_v2, %v750_v53 }
 0x289   : > { %v1831_v4 = vpop.eup %1830  ;;  %1236 = vst [vmem:[%s2144_s18 + $0x54] sm:$0xff] %v1220_v0  ;;  %v1173_v40 = vadd.f32 %v1172_v3, %v2155_v44 }
 0x28a   : > { %1237 = vst [vmem:[%s2144_s18 + $0x5c] sm:$0xff] %v1221_v1  ;;  %v1211_v5 = vpack.c.bf16 %v1831_v4, %v1831_v4  ;;  %v1833_v7 = vpop.eup %1832 }
 0x28b   : > { %1836 = vtanh.f32 %v1173_v40 }
 0x28c   : > { %1227 = vst [vmem:[%s2144_s18 + $0x18] sm:$0xf] %v1211_v5  ;;  %1838 = vtanh.f32 %v1154_v6 }
 0x28d   : > { %v1134_v8 = vpop.f32.mrf.mxu3 }
 0x28e   : > { %v1835_v9 = vpop.eup %1834  ;;  %v1135_v11 = vadd.f32 %v1134_v8, %v749_v58  ;;  %v1158_v21 = vpop.f32.mrf.mxu2 }
 0x28f   : > { %v1210_v12 = vpack.c.bf16 %v1833_v7, %v1835_v9  ;;  %v1159_v22 = vadd.f32 %v1158_v21, %v750_v53 }
 0x290   : > { %1840 = vtanh.f32 %v1135_v11 }
 0x291   : > { %v1837_v13 = vpop.eup %1836  ;;  %1226 = vst [vmem:[%s2144_s18 + $0x10] sm:$0xff] %v1210_v12  ;;  %1842 = vtanh.f32 %v1157_v15 }
 0x292   : > { %v1215_v14 = vpack.c.bf16 %v1837_v13, %v1837_v13  ;;  %v1839_v16 = vpop.eup %1838 }
 0x294   : > { %1231 = vst [vmem:[%s2144_s18 + $0x34] sm:$0xf] %v1215_v14 }
 0x295   : > { %v1137_v17 = vpop.f32.mrf.mxu3 }
 0x296   : > { %v1841_v18 = vpop.eup %1840  ;;  %v1138_v19 = vadd.f32 %v1137_v17, %v749_v58 }
 0x297   : > { %v1214_v20 = vpack.c.bf16 %v1839_v16, %v1841_v18  ;;  %v1843_v23 = vpop.eup %1842 }
 0x298   : > { %1844 = vtanh.f32 %v1138_v19 }
 0x299   : > { %1230 = vst [vmem:[%s2144_s18 + $0x2c] sm:$0xff] %v1214_v20  ;;  %1846 = vtanh.f32 %v1159_v22 }
 0x29d   : > { %v1139_v24 = vpop.f32.mrf.mxu3 }
 0x29e   : > { %v1845_v25 = vpop.eup %1844  ;;  %v1140_v26 = vadd.f32 %v1139_v24, %v749_v58 }
 0x29f   : > { %v1218_v27 = vpack.c.bf16 %v1843_v23, %v1845_v25  ;;  %v1847_v28 = vpop.eup %1846 }
 0x2a0   : > { %1848 = vtanh.f32 %v1140_v26 }
 0x2a1   : > { %1234 = vst [vmem:[%s2144_s18 + $0x48] sm:$0xff] %v1218_v27 }
 0x2a5   : > { %v1175_v29 = vpop.f32.mrf.mxu3 }
 0x2a6   : > { %v1849_v30 = vpop.eup %1848  ;;  %v1176_v31 = vadd.f32 %v1175_v29, %v2155_v44 }
 0x2a7   : > { %v1222_v32 = vpack.c.bf16 %v1847_v28, %v1849_v30 }
 0x2a8   : > { %1850 = vtanh.f32 %v1176_v31 }
 0x2a9   : > { %1238 = vst [vmem:[%s2144_s18 + $0x64] sm:$0xff] %v1222_v32 }
 0x2ad   : > { %v1177_v33 = vpop.f32.mrf.mxu3 }
 0x2ae   : > { %v1851_v34 = vpop.eup %1850  ;;  %v1178_v35 = vadd.f32 %v1177_v33, %v2155_v44 }
 0x2af   : > { %v1219_v36 = vpack.c.bf16 %v1851_v34, %v1851_v34 }
 0x2b0   : > { %1852 = vtanh.f32 %v1178_v35 }
 0x2b1   : > { %1235 = vst [vmem:[%s2144_s18 + $0x50] sm:$0xf] %v1219_v36 }
 0x2b6   : > { %v1853_v37 = vpop.eup %1852 }
 0x2b7   : > { %v1223_v38 = vpack.c.bf16 %v1853_v37, %v1853_v37 }
 0x2b9   : > { %1239 = vst [vmem:[%s2144_s18 + $0x6c] sm:$0xf] %v1223_v38 }
 0x2ba PF: > { %s21_s30 = sadd.s32 1, %s1928_s30  }
 0x2bb   : > { %p18_p7 = scmp.ge.s32.totalorder %s21_s30, 4  }
 0x2bd   :  { %20 = sbr.rel (!%p18_p7) target bundleno = 2 (0x2), region = 95 }
 0x2c2   :  { %1264 = vsyncpa [#allocation3], 1 }
 0x2c3   :  { %1266 = vsyncpa [#allocation3 + $0x1], 1 }
 0x2c4   :  { %1267 = vsyncpa [#allocation5], 1 }

</bundles_post_ra>
